<compile_context>
chip_gen: v7x
topology: tpu7x:2x2x1
jax: 0.10.0
libtpu: 0.0.40
codegen_flags: <defaults>
</compile_context>

<pallas_src>
import jax
import jax.numpy as jnp
from jax.experimental import pallas as pl
from jax.experimental.pallas import tpu as pltpu

_LANE = 128                     # vreg lane width
_SUB = 8                        # vreg sublane count for f32
_SMALL_BATCH_ELEMS = 64 * 1024  # <= 256 KiB of f32: fused XLA beats a custom call


def _round_up(v, m):
    return ((v + m - 1) // m) * m


def scaled_relu_kernel(w_ref, b_ref, x_ref, o_ref):
    # w_ref, b_ref: (1,) f32 in SMEM (scalar reads, no vector loads / DMAs).
    # x_ref, o_ref: (t_rows, 128) f32 in VMEM (lane-dense slab).
    w = w_ref[0]
    b = b_ref[0]
    o_ref[...] = jnp.maximum(x_ref[...] * w + b, 0.0).astype(o_ref.dtype)


def linear_relu(x, weight, bias, *, tile_rows=2048, use_pallas=None):
    """relu(x @ weight.T + bias) for nn.Linear(1, 1).

    x:      (B, 1) float32
    weight: (1, 1) float32  (PyTorch (out_features, in_features) layout)
    bias:   (1,)   float32
    returns (B, 1) float32
    """
    B, in_f = x.shape
    assert in_f == 1 and weight.shape == (1, 1) and bias.shape == (1,)
    # Layout math below assumes f32 (8-sublane packing).
    assert x.dtype == jnp.float32, "linear_relu kernel assumes float32 inputs"

    w_s = weight.reshape(1).astype(jnp.float32)   # scalar weight -> SMEM
    b_s = bias.reshape(1).astype(jnp.float32)     # scalar bias   -> SMEM

    # --- Small-batch fast path -------------------------------------------
    if use_pallas is None:
        use_pallas = B > _SMALL_BATCH_ELEMS
    if not use_pallas:
        return jnp.maximum(x * w_s[0] + b_s[0], 0.0)

    # --- Lane-dense layout: batch occupies the 128-lane axis --------------
    rows = pl.cdiv(B, _LANE)
    if B % _LANE == 0:
        x2d = x.reshape(rows, _LANE)          # free bitcast, no HBM pass
        padded = False
    else:
        rows_aligned = _round_up(rows, _SUB)  # pad only to an 8-sublane multiple
        pad = rows_aligned * _LANE - B
        x2d = jnp.pad(x.reshape(-1), (0, pad)).reshape(rows_aligned, _LANE)
        padded = True

    R = x2d.shape[0]

    # Large tiles (this op is HBM-bandwidth bound), but keep >= 2 grid steps
    # when possible so the "parallel" axis can feed both v7x TensorCores.
    if R >= 2 * _SUB:
        t_rows = min(tile_rows, _round_up(pl.cdiv(R, 2), _SUB))
    else:
        t_rows = min(tile_rows, _round_up(R, _SUB))
    t_rows = max(t_rows, _SUB)

    grid = (pl.cdiv(R, t_rows),)   # ragged last block is masked by Pallas

    n_elems = R * _LANE
    cost = pl.CostEstimate(flops=2 * n_elems, transcendentals=0,
                           bytes_accessed=8 * n_elems)   # 4B read + 4B write

    out2d = pl.pallas_call(
        scaled_relu_kernel,
        out_shape=jax.ShapeDtypeStruct((R, _LANE), jnp.float32),
        grid_spec=pltpu.PrefetchScalarGridSpec(
            num_scalar_prefetch=0,
            grid=grid,
            in_specs=[
                pl.BlockSpec(memory_space=pltpu.MemorySpace.SMEM),   # w (1,)
                pl.BlockSpec(memory_space=pltpu.MemorySpace.SMEM),   # b (1,)
                pl.BlockSpec((t_rows, _LANE), lambda i: (i, 0)),     # x slab
            ],
            out_specs=pl.BlockSpec((t_rows, _LANE), lambda i: (i, 0)),
        ),
        compiler_params=pltpu.CompilerParams(
            dimension_semantics=("parallel",)),          # megacore / 2-TC v7x
        cost_estimate=cost,
        # Donate the freshly-created padded slab as the output buffer; never
        # alias the caller's x (aligned path is a view of the user's array).
        input_output_aliases=({2: 0} if padded else {}),
    )(w_s, b_s, x2d)

    # Padded tail evaluates to relu(b); slice it off before returning.
    return out2d.reshape(-1)[:B].reshape(B, 1)


if __name__ == "__main__":
    key = jax.random.PRNGKey(0)
    kx1, kw, kb, kx2, kx3 = jax.random.split(key, 5)

    # nn.Linear(1, 1) parameters: weight (out, in) = (1, 1), bias (1,).
    weight = jax.random.uniform(kw, (1, 1), dtype=jnp.float32,
                                minval=-1.0, maxval=1.0)
    bias = jax.random.uniform(kb, (1,), dtype=jnp.float32,
                              minval=-1.0, maxval=1.0)

    def ref_fn(inp):
        return jnp.maximum(inp @ weight.T + bias, 0.0)

    # 1) Spec-shaped input x = randn(1, 1): small-batch fast path.
    x1 = jax.random.normal(kx1, (1, 1), dtype=jnp.float32)
    o1 = linear_relu(x1, weight, bias)
    jax.block_until_ready(o1)
    assert o1.shape == (1, 1)
    assert jnp.allclose(o1, ref_fn(x1), atol=1e-6)

    # 2) Lane-aligned batch through the Pallas kernel (bitcast reshape,
    #    multi-step parallel grid: rows=1024 -> t_rows=512 -> grid=2).
    B2 = 128 * 1024
    x2 = jax.random.normal(kx2, (B2, 1), dtype=jnp.float32)
    o2 = linear_relu(x2, weight, bias, use_pallas=True)
    jax.block_until_ready(o2)
    assert o2.shape == (B2, 1)
    assert jnp.allclose(o2, ref_fn(x2), atol=1e-6)

    # 3) Unaligned batch: sublane-only padding + donated padded slab + tail slice.
    B3 = 3 * 128 + 57
    x3 = jax.random.normal(kx3, (B3, 1), dtype=jnp.float32)
    o3 = linear_relu(x3, weight, bias, use_pallas=True)
    jax.block_until_ready(o3)
    assert o3.shape == (B3, 1)
    assert jnp.allclose(o3, ref_fn(x3), atol=1e-6)

    print("KERNEL_OK")
</pallas_src>

<mosaic_0001>
module attributes {stable_mosaic.version = 11 : i64} {
  func.func @scaled_relu_kernel(%arg0: i32, %arg1: memref<1xf32, #tpu.memory_space<smem>>, %arg2: memref<1xf32, #tpu.memory_space<smem>>, %arg3: memref<512x128xf32, #tpu.memory_space<vmem>>, %arg4: memref<512x128xf32, #tpu.memory_space<vmem>>) attributes {dimension_semantics = [#tpu.dimension_semantics<parallel>], iteration_bounds = array<i64: 2>, scalar_prefetch = 0 : i64, scratch_operands = 0 : i64, tpu.core_type = #tpu.core_type<tc>, window_params = [{transform_indices = @transform_0, window_bounds = array<i64: 1>}, {transform_indices = @transform_1, window_bounds = array<i64: 1>}, {transform_indices = @transform_2, window_bounds = array<i64: 512, 128>}, {transform_indices = @transform_3, window_bounds = array<i64: 512, 128>}]} {
    %c0 = arith.constant 0 : index
    %0 = memref.load %arg1[%c0] : memref<1xf32, #tpu.memory_space<smem>>
    %c0_0 = arith.constant 0 : index
    %1 = memref.load %arg2[%c0_0] : memref<1xf32, #tpu.memory_space<smem>>
    %c0_1 = arith.constant 0 : index
    %c0_2 = arith.constant 0 : index
    %2 = vector.load %arg3[%c0_1, %c0_2] : memref<512x128xf32, #tpu.memory_space<vmem>>, vector<512x128xf32>
    %3 = vector.broadcast %0 : f32 to vector<512x128xf32>
    %4 = arith.mulf %2, %3 : vector<512x128xf32>
    %5 = vector.broadcast %1 : f32 to vector<512x128xf32>
    %6 = arith.addf %4, %5 : vector<512x128xf32>
    %cst = arith.constant 0.000000e+00 : f32
    %7 = vector.broadcast %cst : f32 to vector<512x128xf32>
    %8 = arith.maximumf %6, %7 : vector<512x128xf32>
    %c0_3 = arith.constant 0 : index
    %c0_4 = arith.constant 0 : index
    %9 = vector.load %arg4[%c0_3, %c0_4] : memref<512x128xf32, #tpu.memory_space<vmem>>, vector<512x128xf32>
    tpu.vector_store %arg4[%c0_3, %c0_4], %8 {strides = array<i32>} : memref<512x128xf32, #tpu.memory_space<vmem>>, vector<512x128xf32>,
    return
  }
  func.func @transform_0(%arg0: i32) -> i32 {
    %c0_i32 = arith.constant 0 : i32
    %c0_i32_0 = arith.constant 0 : i32
    return %c0_i32 : i32
  }
  func.func @transform_1(%arg0: i32) -> i32 {
    %c0_i32 = arith.constant 0 : i32
    %c0_i32_0 = arith.constant 0 : i32
    return %c0_i32 : i32
  }
  func.func @transform_2(%arg0: i32) -> (i32, i32) {
    %c0_i32 = arith.constant 0 : i32
    %c0_i32_0 = arith.constant 0 : i32
    return %arg0, %c0_i32 : i32, i32
  }
  func.func @transform_3(%arg0: i32) -> (i32, i32) {
    %c0_i32 = arith.constant 0 : i32
    %c0_i32_0 = arith.constant 0 : i32
    return %arg0, %c0_i32 : i32, i32
  }
}

</mosaic_0001>

<bundles_post_ra>
// kernel: tpu_custom_call.1
= control target key start
LH: loop header
LB: loop body
LE: loop exit
PB: predicated region body
PF: predicated region fallthrough
CT: control target
= control target key end

     0   :  { %s1231_s0 = inlined_call_operand.<no memory space> [shape: f32[1], index: 0, kind: input, shape index: {}]   ;;  %s1232_s1 = inlined_call_operand.<no memory space> [shape: f32[1], index: 1, kind: input, shape index: {}]   ;;  %s1233_s2 = inlined_call_operand.hbm [shape: f32[1024,128], index: 2, kind: input, shape index: {}]   ;;  %s1234_s3 = inlined_call_operand.hbm [shape: f32[1024,128], index: 3, kind: output, shape index: {}]  }
   0x1   :  { %8 = sst [smem:[#allocation2]] %s1231_s0 }
   0x2   :  { %9 = sst [smem:[#allocation3]] %s1232_s1 }
   0x3   :  { %10 = vsyncpa [#allocation5], 0 }
   0x4   :  { %12 = vsyncpa [#allocation5 + $0x1], 0 }
   0x5   :  { %13 = vsyncpa [#allocation6], 0 }
   0x6   :  { %15 = vsyncpa [#allocation6 + $0x1], 0  ;;  %s800_s16 = smov 0   ;;  %s802_s17 = smov 0  }
   0x7   :  { %s804_s18 = smov 0   ;;  %s806_s19 = smov 0  }
   0x8 LB: > { %s821_s0 = sadd.s32 4294967295, %s766_s19   ;;  %s604_s1 = sadd.s32 4294967294, %s766_s19   ;;  %s766_s19 = sphi %s806_s19, %s1247_s19   ;;  %s762_s18 = sphi %s804_s18, %s1246_s18   ;;  %s758_s17 = sphi %s802_s17, %s1245_s17   ;;  %s754_s16 = sphi %s800_s16, %s1244_s16  }
   0x9   : > { %s825_s20 = sadd.s32 1, %s766_s19   ;;  %s70_s21 = sadd.s32 1, %s762_s18 }
   0xa   : > { %s67_s22 = ssub.s32 %s766_s19, %s825_s20  ;;  %p77_p0 = scmp.ne.s32.totalorder %s762_s18, %s758_s17 }
   0xb   : > { %p68_p1 = scmp.eq.s32.totalorder %s67_s22, 0  ;;  %p78_p2 = scmp.eq.s32.totalorder %s766_s19, 0 }
   0xc   : > { %p83_p3 = scmp.ne.s32.totalorder %s758_s17, %s754_s16  ;;  %p84_p4 = scmp.eq.s32.totalorder %s821_s0, 0 }
   0xd   : > { %s837_s23 = scalar_select %p68_p1, %s762_s18, %s70_s21  }
   0xe   : > { %p839_p5 = por %p78_p2, %p77_p0  ;;  %p843_p6 = por %p84_p4, %p83_p3 }
   0xf   : > { %p107_p7 = scmp.eq.s32.totalorder %s821_s0, 1  ;;  %p113_p8 = scmp.eq.s32.totalorder %s604_s1, 1 }
  0x10   : > { %p632_p10 = scmp.lt.s32.totalorder %s766_s19, 2  ;;  %s139_s28 = sand.u32 1, %s762_s18  }
  0x11   : > { %p850_p11 = por %p107_p7, %p77_p0  ;;  %p854_p12 = por %p113_p8, %p83_p3 }
  0x12   : > { %s618_s29 = sshll.u32 %s766_s19, 13  ;;  %s607_s30 = sshll.u32 %s139_s28, 9 }
  0x13   : > { %s1238_s26 = scalar_select %p850_p11, 1, 0 }
  0x14   : > { %s1239_s27 = scalar_select %p854_p12, 1, 0 }
  0x15   : > { %s863_s6 = scalar_lea.hbm %s1233_s2, %s618_s29  ;;  %s143_s7 = scalar_lea.vmem [#allocation4], %s607_s30 }
  0x16   : > { %s150_s8 = sshll.u32 %s143_s7, 4  ;;  %p867_p13 = pnand %p632_p10, %p839_p5  ;;  %s871_s8 = int_to_ptr.vmem [resolvable:$true] %s150_s8 }
  0x17   : > { %s873_s10 = scalar_lea.sflag [#allocation5], %s139_s28  ;;  %s670_s11 = scalar_lea.hbm %s863_s6, 8192 }
  0x18   : > { %p671_p0 = scmp.ne.s32.totalorder %s863_s6, %s670_s11  ;;  %p672_p1 = pneg %p867_p13 }
  0x19   : > { %s675_s14 = scalar_lea.hbm %s1233_s2, 16384  ;;  %p676_p4 = scmp.lt.u32.totalorder %s863_s6, %s1233_s2 }
  0x1a   : > { %p673_p2 = pnand %p672_p1, %p671_p0  ;;  %p677_p5 = scmp.lt.u32.totalorder %s675_s14, %s670_s11 }
  0x1b   : > { %p679_p8 = scmp.lt.u32.totalorder %s670_s11, %s863_s6 }
  0x1c   : > { %p674_p3 = pneg %p673_p2  ;;  %p678_p7 = por %p677_p5, %p676_p4 }
  0x1e   : > { %p680_p10 = por %p679_p8, %p678_p7 }
  0x20   : > { %p681_p9 = pnand %p680_p10, %p674_p3 }
  0x22   : > { %684 = shalt.err (!%p681_p9)
}
  0x23   : > { %s685_s21 = scalar_lea.vmem %s871_s8, 8192  ;;  %s768_s22 = smov [#allocation4]  }
  0x24   : > { %p686_p0 = scmp.ne.s32.totalorder %s871_s8, %s685_s21  ;;  %s690_s24 = sshll.u32 %s768_s22, 4  ;;  %s691_s24 = int_to_ptr.vmem [resolvable:$false] %s690_s24 }
  0x25   : > { %s692_s28 = scalar_lea.vmem %s691_s24, 16384  ;;  %p693_p11 = scmp.lt.s32.totalorder %s871_s8, %s691_s24 }
  0x26   : > { %p688_p2 = pnand %p686_p0, %p672_p1  ;;  %p694_p4 = scmp.lt.s32.totalorder %s692_s28, %s685_s21 }
  0x28   : > { %p689_p12 = pneg %p688_p2  ;;  %p695_p5 = por %p694_p4, %p693_p11 }
  0x2a   : > { %p696_p7 = pnand %p695_p5, %p689_p12 }
  0x2c   : > { %699 = shalt.err (!%p696_p7)
}
  0x2d   : > { %s769_s29 = smov 128   ;;  %s770_s30 = smov 8  }
  0x2e   : > { %627 = dma.hbm_to_vmem [thread:$0]  (!%p867_p13), %s863_s6, 8192, %s871_s8, %s873_s10, %s769_s29, %s769_s29, %s770_s30  }
  0x2f   : > { %p610_p9 = scmp.ge.s32.totalorder %s766_s19, 1  ;;  %p158_p1 = scmp.lt.s32.totalorder %s766_s19, 3 }
  0x31   : > { %p159_p3 = pnand %p610_p9, %p158_p1 }
  0x32   : > { %s904_s4 = sand.u32 (!%p159_p3), 1, %s758_s17  }
  0x33   : > { %162 = sbr.rel (%p159_p3) target bundleno = 133 (0x85), region = 32  ;;  %s611_s5 = sshll.u32 (!%p159_p3), %s904_s4, 9 }
  0x34   : > { %s165_s7 = scalar_lea.sflag (!%p159_p3), [#allocation5], %s904_s4  ;;  %s910_s11 = scalar_lea.vmem (!%p159_p3), [#allocation4], %s611_s5 }
  0x3a   : > { %745 = dma.done.wait (%p843_p6), %s165_s7, 8192  }
  0x3b   : > { %747 = vsyncadd (%p843_p6), %s165_s7, 4294959104  ;;  %s193_s6 = sld [smem:[#allocation2]]  ;;  %v195_v0 = vld [vmem:[%s910_s11] sm:$0xff]  ;;  %v196_v3 = vld [vmem:[%s910_s11 + $0x8] sm:$0xff]  ;;  %s953_s25 = scalar_lea.vmem [#allocation7], %s611_s5 }
  0x3c   : > { %s194_s8 = sld [smem:[#allocation3]]  ;;  %v197_v6 = vld [vmem:[%s910_s11 + $0x10] sm:$0xff]  ;;  %v198_v7 = vld [vmem:[%s910_s11 + $0x18] sm:$0xff]  ;;  %v199_v8 = vld [vmem:[%s910_s11 + $0x20] sm:$0xff]  ;;  %s619_s9 = sshll.u32 %s821_s0, 13 }
  0x3d   : > { %v200_v12 = vld [vmem:[%s910_s11 + $0x28] sm:$0xff]  ;;  %v201_v13 = vld [vmem:[%s910_s11 + $0x30] sm:$0xff]  ;;  %v202_v14 = vld [vmem:[%s910_s11 + $0x38] sm:$0xff]  ;;  %s531_s10 = sshll.u32 %s953_s25, 4  ;;  %s1179_s13 = scalar_lea.hbm %s1234_s3, %s619_s9  ;;  %s1181_s10 = int_to_ptr.vmem [resolvable:$true] %s531_s10 }
  0x3e   : > { %v203_v23 = vld [vmem:[%s910_s11 + $0x40] sm:$0xff]  ;;  %v204_v24 = vld [vmem:[%s910_s11 + $0x48] sm:$0xff]  ;;  %v205_v29 = vld [vmem:[%s910_s11 + $0x50] sm:$0xff]  ;;  %s518_s14 = scalar_lea.sflag [#allocation6], %s904_s4  ;;  %s700_s15 = scalar_lea.vmem %s1181_s10, 8192 }
  0x3f   : > { %v206_v30 = vld [vmem:[%s910_s11 + $0x58] sm:$0xff]  ;;  %v207_v31 = vld [vmem:[%s910_s11 + $0x60] sm:$0xff]  ;;  %v208_v36 = vld [vmem:[%s910_s11 + $0x68] sm:$0xff]  ;;  %p701_p6 = scmp.ne.s32.totalorder %s1181_s10, %s700_s15  ;;  %p1241_p11 = scmp.ne.s32.totalorder %s1238_s26, 0 }
  0x40   : > { %v209_v37 = vld [vmem:[%s910_s11 + $0x70] sm:$0xff]  ;;  %v210_v42 = vld [vmem:[%s910_s11 + $0x78] sm:$0xff]  ;;  %v211_v55 = vld [vmem:[%s910_s11 + $0x80] sm:$0xff]  ;;  %s771_s1 = smov [#allocation7]  }
  0x41   : > { %v917_v1 = vstv %s193_s6  ;;  %v212_v56 = vld [vmem:[%s910_s11 + $0x88] sm:$0xff]  ;;  %v213_v61 = vld [vmem:[%s910_s11 + $0x90] sm:$0xff]  ;;  %v214_v62 = vld [vmem:[%s910_s11 + $0x98] sm:$0xff]  ;;  %p702_p12 = pnand %p701_p6, %p1241_p11  ;;  %s704_s21 = sshll.u32 %s771_s1, 4  ;;  %s705_s21 = int_to_ptr.vmem [resolvable:$false] %s704_s21 }
  0x42   : > { %v919_v2 = vstv %s194_s8  ;;  %v260_v4 = vmul.f32 %v917_v1, %v195_v0  ;;  %v261_v5 = vmul.f32 %v917_v1, %v196_v3  ;;  %v262_v9 = vmul.f32 %v917_v1, %v197_v6  ;;  %v215_v63 = vld [vmem:[%s910_s11 + $0xa0] sm:$0xff]  ;;  %v216_v6 = vld [vmem:[%s910_s11 + $0xa8] sm:$0xff]  ;;  %s706_s22 = scalar_lea.vmem %s705_s21, 16384  ;;  %p707_p8 = scmp.lt.s32.totalorder %s1181_s10, %s705_s21 }
  0x43   : > { %v263_v10 = vmul.f32 %v917_v1, %v198_v7  ;;  %v264_v11 = vmul.f32 %v917_v1, %v199_v8  ;;  %v265_v17 = vmul.f32 %v917_v1, %v200_v12  ;;  %v266_v18 = vmul.f32 %v917_v1, %v201_v13  ;;  %v217_v7 = vld [vmem:[%s910_s11 + $0xb0] sm:$0xff]  ;;  %v218_v12 = vld [vmem:[%s910_s11 + $0xb8] sm:$0xff]  ;;  %p703_p13 = pneg %p702_p12  ;;  %p708_p10 = scmp.lt.s32.totalorder %s706_s22, %s700_s15 }
  0x44   : > { %v325_v15 = vadd.f32 %v919_v2, %v260_v4  ;;  %v326_v16 = vadd.f32 %v919_v2, %v261_v5  ;;  %v327_v19 = vadd.f32 %v919_v2, %v262_v9  ;;  %v267_v22 = vmul.f32 %v917_v1, %v202_v14 }
  0x45   : > { %v328_v20 = vadd.f32 %v919_v2, %v263_v10  ;;  %v329_v21 = vadd.f32 %v919_v2, %v264_v11  ;;  %v330_v27 = vadd.f32 %v919_v2, %v265_v17  ;;  %v331_v28 = vadd.f32 %v919_v2, %v266_v18  ;;  %p709_p0 = por %p708_p10, %p707_p8 }
  0x46   : > { %v389_v25 = vmax.f32 %v325_v15, 0.0  ;;  %v390_v26 = vmax.f32 %v326_v16, 0.0  ;;  %v391_v32 = vmax.f32 %v327_v19, 0.0  ;;  %v332_v35 = vadd.f32 %v919_v2, %v267_v22 }
  0x47   : > { %v392_v33 = vmax.f32 %v328_v20, 0.0  ;;  %v393_v34 = vmax.f32 %v329_v21, 0.0  ;;  %v394_v38 = vmax.f32 %v330_v27, 0.0  ;;  %v395_v39 = vmax.f32 %v331_v28, 0.0  ;;  %p710_p2 = pnand %p709_p0, %p703_p13 }
  0x48   : > { %453 = vst [vmem:[%s953_s25] sm:$0xff] %v389_v25  ;;  %454 = vst [vmem:[%s953_s25 + $0x8] sm:$0xff] %v390_v26  ;;  %v268_v40 = vmul.f32 %v917_v1, %v203_v23  ;;  %v269_v41 = vmul.f32 %v917_v1, %v204_v24  ;;  %v396_v43 = vmax.f32 %v332_v35, 0.0  ;;  %v270_v44 = vmul.f32 %v917_v1, %v205_v29  ;;  %v219_v25 = vld [vmem:[%s910_s11 + $0xc0] sm:$0xff]  ;;  %v220_v26 = vld [vmem:[%s910_s11 + $0xc8] sm:$0xff] }
  0x49   : > { %455 = vst [vmem:[%s953_s25 + $0x10] sm:$0xff] %v391_v32  ;;  %456 = vst [vmem:[%s953_s25 + $0x18] sm:$0xff] %v392_v33  ;;  %v271_v45 = vmul.f32 %v917_v1, %v206_v30  ;;  %v272_v46 = vmul.f32 %v917_v1, %v207_v31  ;;  %v273_v49 = vmul.f32 %v917_v1, %v208_v36  ;;  %v221_v31 = vld [vmem:[%s910_s11 + $0xd0] sm:$0xff]  ;;  %v222_v32 = vld [vmem:[%s910_s11 + $0xd8] sm:$0xff] }
  0x4a   : > { %457 = vst [vmem:[%s953_s25 + $0x20] sm:$0xff] %v393_v34  ;;  %458 = vst [vmem:[%s953_s25 + $0x28] sm:$0xff] %v394_v38  ;;  %v333_v47 = vadd.f32 %v919_v2, %v268_v40  ;;  %v334_v48 = vadd.f32 %v919_v2, %v269_v41  ;;  %v274_v50 = vmul.f32 %v917_v1, %v209_v37  ;;  %v223_v33 = vld [vmem:[%s910_s11 + $0xe0] sm:$0xff]  ;;  %v224_v38 = vld [vmem:[%s910_s11 + $0xe8] sm:$0xff] }
  0x4b   : > { %459 = vst [vmem:[%s953_s25 + $0x30] sm:$0xff] %v395_v39  ;;  %460 = vst [vmem:[%s953_s25 + $0x38] sm:$0xff] %v396_v43  ;;  %v335_v51 = vadd.f32 %v919_v2, %v270_v44  ;;  %v336_v52 = vadd.f32 %v919_v2, %v271_v45  ;;  %v337_v53 = vadd.f32 %v919_v2, %v272_v46  ;;  %v225_v39 = vld [vmem:[%s910_s11 + $0xf0] sm:$0xff]  ;;  %v226_v44 = vld [vmem:[%s910_s11 + $0xf8] sm:$0xff] }
  0x4c   : > { %v275_v54 = vmul.f32 %v917_v1, %v210_v42  ;;  %v397_v57 = vmax.f32 %v333_v47, 0.0  ;;  %v398_v58 = vmax.f32 %v334_v48, 0.0  ;;  %v338_v59 = vadd.f32 %v919_v2, %v273_v49 }
  0x4d   : > { %v339_v60 = vadd.f32 %v919_v2, %v274_v50  ;;  %v399_v0 = vmax.f32 %v335_v51, 0.0  ;;  %v400_v3 = vmax.f32 %v336_v52, 0.0  ;;  %v401_v4 = vmax.f32 %v337_v53, 0.0 }
  0x4e   : > { %v340_v5 = vadd.f32 %v919_v2, %v275_v54  ;;  %461 = vst [vmem:[%s953_s25 + $0x40] sm:$0xff] %v397_v57  ;;  %462 = vst [vmem:[%s953_s25 + $0x48] sm:$0xff] %v398_v58  ;;  %v402_v8 = vmax.f32 %v338_v59, 0.0  ;;  %v276_v10 = vmul.f32 %v917_v1, %v211_v55  ;;  %v277_v11 = vmul.f32 %v917_v1, %v212_v56  ;;  %v227_v57 = vld [vmem:[%s910_s11 + $0x100] sm:$0xff]  ;;  %v228_v58 = vld [vmem:[%s910_s11 + $0x108] sm:$0xff] }
  0x4f   : > { %v403_v9 = vmax.f32 %v339_v60, 0.0  ;;  %463 = vst [vmem:[%s953_s25 + $0x50] sm:$0xff] %v399_v0  ;;  %464 = vst [vmem:[%s953_s25 + $0x58] sm:$0xff] %v400_v3  ;;  %v278_v14 = vmul.f32 %v917_v1, %v213_v61  ;;  %v279_v15 = vmul.f32 %v917_v1, %v214_v62  ;;  %v280_v16 = vmul.f32 %v917_v1, %v215_v63  ;;  %v229_v63 = vld [vmem:[%s910_s11 + $0x110] sm:$0xff]  ;;  %v230_v0 = vld [vmem:[%s910_s11 + $0x118] sm:$0xff] }
  0x50   : > { %465 = vst [vmem:[%s953_s25 + $0x60] sm:$0xff] %v401_v4  ;;  %v404_v13 = vmax.f32 %v340_v5, 0.0  ;;  %466 = vst [vmem:[%s953_s25 + $0x68] sm:$0xff] %v402_v8  ;;  %v341_v17 = vadd.f32 %v919_v2, %v276_v10  ;;  %v342_v18 = vadd.f32 %v919_v2, %v277_v11  ;;  %v281_v19 = vmul.f32 %v917_v1, %v216_v6  ;;  %v231_v3 = vld [vmem:[%s910_s11 + $0x120] sm:$0xff]  ;;  %v232_v8 = vld [vmem:[%s910_s11 + $0x128] sm:$0xff] }
  0x51   : > { %467 = vst [vmem:[%s953_s25 + $0x70] sm:$0xff] %v403_v9  ;;  %v282_v20 = vmul.f32 %v917_v1, %v217_v7  ;;  %v343_v21 = vadd.f32 %v919_v2, %v278_v14  ;;  %v344_v22 = vadd.f32 %v919_v2, %v279_v15  ;;  %v345_v23 = vadd.f32 %v919_v2, %v280_v16  ;;  %v233_v9 = vld [vmem:[%s910_s11 + $0x130] sm:$0xff]  ;;  %v234_v14 = vld [vmem:[%s910_s11 + $0x138] sm:$0xff] }
  0x52   : > { %468 = vst [vmem:[%s953_s25 + $0x78] sm:$0xff] %v404_v13  ;;  %v283_v24 = vmul.f32 %v917_v1, %v218_v12  ;;  %v405_v27 = vmax.f32 %v341_v17, 0.0  ;;  %v406_v28 = vmax.f32 %v342_v18, 0.0  ;;  %v346_v29 = vadd.f32 %v919_v2, %v281_v19 }
  0x53   : > { %v347_v30 = vadd.f32 %v919_v2, %v282_v20  ;;  %v407_v34 = vmax.f32 %v343_v21, 0.0  ;;  %v408_v35 = vmax.f32 %v344_v22, 0.0  ;;  %v409_v36 = vmax.f32 %v345_v23, 0.0 }
  0x54   : > { %v348_v37 = vadd.f32 %v919_v2, %v283_v24  ;;  %469 = vst [vmem:[%s953_s25 + $0x80] sm:$0xff] %v405_v27  ;;  %470 = vst [vmem:[%s953_s25 + $0x88] sm:$0xff] %v406_v28  ;;  %v410_v40 = vmax.f32 %v346_v29, 0.0  ;;  %v284_v42 = vmul.f32 %v917_v1, %v219_v25  ;;  %v285_v43 = vmul.f32 %v917_v1, %v220_v26  ;;  %v235_v27 = vld [vmem:[%s910_s11 + $0x140] sm:$0xff]  ;;  %v236_v28 = vld [vmem:[%s910_s11 + $0x148] sm:$0xff] }
  0x55   : > { %v411_v41 = vmax.f32 %v347_v30, 0.0  ;;  %471 = vst [vmem:[%s953_s25 + $0x90] sm:$0xff] %v407_v34  ;;  %472 = vst [vmem:[%s953_s25 + $0x98] sm:$0xff] %v408_v35  ;;  %v286_v46 = vmul.f32 %v917_v1, %v221_v31  ;;  %v287_v47 = vmul.f32 %v917_v1, %v222_v32  ;;  %v288_v48 = vmul.f32 %v917_v1, %v223_v33  ;;  %v237_v33 = vld [vmem:[%s910_s11 + $0x150] sm:$0xff]  ;;  %v238_v34 = vld [vmem:[%s910_s11 + $0x158] sm:$0xff] }
  0x56   : > { %473 = vst [vmem:[%s953_s25 + $0xa0] sm:$0xff] %v409_v36  ;;  %v412_v45 = vmax.f32 %v348_v37, 0.0  ;;  %474 = vst [vmem:[%s953_s25 + $0xa8] sm:$0xff] %v410_v40  ;;  %v349_v49 = vadd.f32 %v919_v2, %v284_v42  ;;  %v350_v50 = vadd.f32 %v919_v2, %v285_v43  ;;  %v289_v51 = vmul.f32 %v917_v1, %v224_v38  ;;  %v239_v35 = vld [vmem:[%s910_s11 + $0x160] sm:$0xff]  ;;  %v240_v40 = vld [vmem:[%s910_s11 + $0x168] sm:$0xff] }
  0x57   : > { %475 = vst [vmem:[%s953_s25 + $0xb0] sm:$0xff] %v411_v41  ;;  %v290_v52 = vmul.f32 %v917_v1, %v225_v39  ;;  %v351_v53 = vadd.f32 %v919_v2, %v286_v46  ;;  %v352_v54 = vadd.f32 %v919_v2, %v287_v47  ;;  %v353_v55 = vadd.f32 %v919_v2, %v288_v48  ;;  %v241_v41 = vld [vmem:[%s910_s11 + $0x170] sm:$0xff]  ;;  %v242_v46 = vld [vmem:[%s910_s11 + $0x178] sm:$0xff] }
  0x58   : > { %476 = vst [vmem:[%s953_s25 + $0xb8] sm:$0xff] %v412_v45  ;;  %v291_v56 = vmul.f32 %v917_v1, %v226_v44  ;;  %v413_v59 = vmax.f32 %v349_v49, 0.0  ;;  %v414_v60 = vmax.f32 %v350_v50, 0.0  ;;  %v354_v61 = vadd.f32 %v919_v2, %v289_v51 }
  0x59   : > { %v355_v62 = vadd.f32 %v919_v2, %v290_v52  ;;  %v415_v4 = vmax.f32 %v351_v53, 0.0  ;;  %v416_v5 = vmax.f32 %v352_v54, 0.0  ;;  %v417_v6 = vmax.f32 %v353_v55, 0.0 }
  0x5a   : > { %v356_v7 = vadd.f32 %v919_v2, %v291_v56  ;;  %477 = vst [vmem:[%s953_s25 + $0xc0] sm:$0xff] %v413_v59  ;;  %478 = vst [vmem:[%s953_s25 + $0xc8] sm:$0xff] %v414_v60  ;;  %v418_v10 = vmax.f32 %v354_v61, 0.0  ;;  %v292_v12 = vmul.f32 %v917_v1, %v227_v57  ;;  %v293_v13 = vmul.f32 %v917_v1, %v228_v58  ;;  %v243_v59 = vld [vmem:[%s910_s11 + $0x180] sm:$0xff]  ;;  %v244_v60 = vld [vmem:[%s910_s11 + $0x188] sm:$0xff] }
  0x5b   : > { %v419_v11 = vmax.f32 %v355_v62, 0.0  ;;  %479 = vst [vmem:[%s953_s25 + $0xd0] sm:$0xff] %v415_v4  ;;  %480 = vst [vmem:[%s953_s25 + $0xd8] sm:$0xff] %v416_v5  ;;  %v294_v16 = vmul.f32 %v917_v1, %v229_v63  ;;  %v295_v17 = vmul.f32 %v917_v1, %v230_v0  ;;  %v296_v18 = vmul.f32 %v917_v1, %v231_v3  ;;  %v245_v3 = vld [vmem:[%s910_s11 + $0x190] sm:$0xff]  ;;  %v246_v4 = vld [vmem:[%s910_s11 + $0x198] sm:$0xff] }
  0x5c   : > { %481 = vst [vmem:[%s953_s25 + $0xe0] sm:$0xff] %v417_v6  ;;  %v420_v15 = vmax.f32 %v356_v7, 0.0  ;;  %482 = vst [vmem:[%s953_s25 + $0xe8] sm:$0xff] %v418_v10  ;;  %v357_v19 = vadd.f32 %v919_v2, %v292_v12  ;;  %v358_v20 = vadd.f32 %v919_v2, %v293_v13  ;;  %v297_v21 = vmul.f32 %v917_v1, %v232_v8  ;;  %v247_v5 = vld [vmem:[%s910_s11 + $0x1a0] sm:$0xff]  ;;  %v248_v10 = vld [vmem:[%s910_s11 + $0x1a8] sm:$0xff] }
  0x5d   : > { %483 = vst [vmem:[%s953_s25 + $0xf0] sm:$0xff] %v419_v11  ;;  %v298_v22 = vmul.f32 %v917_v1, %v233_v9  ;;  %v359_v23 = vadd.f32 %v919_v2, %v294_v16  ;;  %v360_v24 = vadd.f32 %v919_v2, %v295_v17  ;;  %v361_v25 = vadd.f32 %v919_v2, %v296_v18  ;;  %v249_v11 = vld [vmem:[%s910_s11 + $0x1b0] sm:$0xff]  ;;  %v250_v16 = vld [vmem:[%s910_s11 + $0x1b8] sm:$0xff] }
  0x5e   : > { %484 = vst [vmem:[%s953_s25 + $0xf8] sm:$0xff] %v420_v15  ;;  %v299_v26 = vmul.f32 %v917_v1, %v234_v14  ;;  %v421_v29 = vmax.f32 %v357_v19, 0.0  ;;  %v422_v30 = vmax.f32 %v358_v20, 0.0  ;;  %v362_v31 = vadd.f32 %v919_v2, %v297_v21 }
  0x5f   : > { %v363_v32 = vadd.f32 %v919_v2, %v298_v22  ;;  %v423_v36 = vmax.f32 %v359_v23, 0.0  ;;  %v424_v37 = vmax.f32 %v360_v24, 0.0  ;;  %v425_v38 = vmax.f32 %v361_v25, 0.0 }
  0x60   : > { %v364_v39 = vadd.f32 %v919_v2, %v299_v26  ;;  %485 = vst [vmem:[%s953_s25 + $0x100] sm:$0xff] %v421_v29  ;;  %486 = vst [vmem:[%s953_s25 + $0x108] sm:$0xff] %v422_v30  ;;  %v426_v42 = vmax.f32 %v362_v31, 0.0  ;;  %v300_v44 = vmul.f32 %v917_v1, %v235_v27  ;;  %v301_v45 = vmul.f32 %v917_v1, %v236_v28  ;;  %v251_v29 = vld [vmem:[%s910_s11 + $0x1c0] sm:$0xff]  ;;  %v252_v30 = vld [vmem:[%s910_s11 + $0x1c8] sm:$0xff] }
  0x61   : > { %v427_v43 = vmax.f32 %v363_v32, 0.0  ;;  %487 = vst [vmem:[%s953_s25 + $0x110] sm:$0xff] %v423_v36  ;;  %488 = vst [vmem:[%s953_s25 + $0x118] sm:$0xff] %v424_v37  ;;  %v302_v48 = vmul.f32 %v917_v1, %v237_v33  ;;  %v303_v49 = vmul.f32 %v917_v1, %v238_v34  ;;  %v304_v50 = vmul.f32 %v917_v1, %v239_v35  ;;  %v253_v35 = vld [vmem:[%s910_s11 + $0x1d0] sm:$0xff]  ;;  %v254_v36 = vld [vmem:[%s910_s11 + $0x1d8] sm:$0xff] }
  0x62   : > { %489 = vst [vmem:[%s953_s25 + $0x120] sm:$0xff] %v425_v38  ;;  %v428_v47 = vmax.f32 %v364_v39, 0.0  ;;  %490 = vst [vmem:[%s953_s25 + $0x128] sm:$0xff] %v426_v42  ;;  %v365_v51 = vadd.f32 %v919_v2, %v300_v44  ;;  %v366_v52 = vadd.f32 %v919_v2, %v301_v45  ;;  %v305_v53 = vmul.f32 %v917_v1, %v240_v40  ;;  %v255_v37 = vld [vmem:[%s910_s11 + $0x1e0] sm:$0xff]  ;;  %v256_v42 = vld [vmem:[%s910_s11 + $0x1e8] sm:$0xff] }
  0x63   : > { %491 = vst [vmem:[%s953_s25 + $0x130] sm:$0xff] %v427_v43  ;;  %v306_v54 = vmul.f32 %v917_v1, %v241_v41  ;;  %v367_v55 = vadd.f32 %v919_v2, %v302_v48  ;;  %v368_v56 = vadd.f32 %v919_v2, %v303_v49  ;;  %v369_v57 = vadd.f32 %v919_v2, %v304_v50  ;;  %v257_v43 = vld [vmem:[%s910_s11 + $0x1f0] sm:$0xff]  ;;  %v258_v48 = vld [vmem:[%s910_s11 + $0x1f8] sm:$0xff] }
  0x64   : > { %492 = vst [vmem:[%s953_s25 + $0x138] sm:$0xff] %v428_v47  ;;  %v307_v58 = vmul.f32 %v917_v1, %v242_v46  ;;  %v429_v61 = vmax.f32 %v365_v51, 0.0  ;;  %v430_v62 = vmax.f32 %v366_v52, 0.0  ;;  %v370_v63 = vadd.f32 %v919_v2, %v305_v53 }
  0x65   : > { %v371_v0 = vadd.f32 %v919_v2, %v306_v54  ;;  %v431_v6 = vmax.f32 %v367_v55, 0.0  ;;  %v432_v7 = vmax.f32 %v368_v56, 0.0  ;;  %v433_v8 = vmax.f32 %v369_v57, 0.0 }
  0x66   : > { %v372_v9 = vadd.f32 %v919_v2, %v307_v58  ;;  %493 = vst [vmem:[%s953_s25 + $0x140] sm:$0xff] %v429_v61  ;;  %494 = vst [vmem:[%s953_s25 + $0x148] sm:$0xff] %v430_v62  ;;  %v434_v12 = vmax.f32 %v370_v63, 0.0  ;;  %v308_v14 = vmul.f32 %v917_v1, %v243_v59  ;;  %v309_v15 = vmul.f32 %v917_v1, %v244_v60 }
  0x67   : > { %v435_v13 = vmax.f32 %v371_v0, 0.0  ;;  %495 = vst [vmem:[%s953_s25 + $0x150] sm:$0xff] %v431_v6  ;;  %496 = vst [vmem:[%s953_s25 + $0x158] sm:$0xff] %v432_v7  ;;  %v310_v18 = vmul.f32 %v917_v1, %v245_v3  ;;  %v311_v19 = vmul.f32 %v917_v1, %v246_v4  ;;  %v312_v20 = vmul.f32 %v917_v1, %v247_v5 }
  0x68   : > { %497 = vst [vmem:[%s953_s25 + $0x160] sm:$0xff] %v433_v8  ;;  %v436_v17 = vmax.f32 %v372_v9, 0.0  ;;  %498 = vst [vmem:[%s953_s25 + $0x168] sm:$0xff] %v434_v12  ;;  %v373_v21 = vadd.f32 %v919_v2, %v308_v14  ;;  %v374_v22 = vadd.f32 %v919_v2, %v309_v15  ;;  %v313_v23 = vmul.f32 %v917_v1, %v248_v10 }
  0x69   : > { %499 = vst [vmem:[%s953_s25 + $0x170] sm:$0xff] %v435_v13  ;;  %v314_v24 = vmul.f32 %v917_v1, %v249_v11  ;;  %v375_v25 = vadd.f32 %v919_v2, %v310_v18  ;;  %v376_v26 = vadd.f32 %v919_v2, %v311_v19  ;;  %v377_v27 = vadd.f32 %v919_v2, %v312_v20 }
  0x6a   : > { %500 = vst [vmem:[%s953_s25 + $0x178] sm:$0xff] %v436_v17  ;;  %v315_v28 = vmul.f32 %v917_v1, %v250_v16  ;;  %v437_v31 = vmax.f32 %v373_v21, 0.0  ;;  %v438_v32 = vmax.f32 %v374_v22, 0.0  ;;  %v378_v33 = vadd.f32 %v919_v2, %v313_v23 }
  0x6b   : > { %v379_v34 = vadd.f32 %v919_v2, %v314_v24  ;;  %v439_v38 = vmax.f32 %v375_v25, 0.0  ;;  %v440_v39 = vmax.f32 %v376_v26, 0.0  ;;  %v441_v40 = vmax.f32 %v377_v27, 0.0 }
  0x6c   : > { %v380_v41 = vadd.f32 %v919_v2, %v315_v28  ;;  %501 = vst [vmem:[%s953_s25 + $0x180] sm:$0xff] %v437_v31  ;;  %502 = vst [vmem:[%s953_s25 + $0x188] sm:$0xff] %v438_v32  ;;  %v442_v44 = vmax.f32 %v378_v33, 0.0  ;;  %v316_v46 = vmul.f32 %v917_v1, %v251_v29  ;;  %v317_v47 = vmul.f32 %v917_v1, %v252_v30 }
  0x6d   : > { %v443_v45 = vmax.f32 %v379_v34, 0.0  ;;  %503 = vst [vmem:[%s953_s25 + $0x190] sm:$0xff] %v439_v38  ;;  %504 = vst [vmem:[%s953_s25 + $0x198] sm:$0xff] %v440_v39  ;;  %v318_v50 = vmul.f32 %v917_v1, %v253_v35  ;;  %v319_v51 = vmul.f32 %v917_v1, %v254_v36  ;;  %v320_v52 = vmul.f32 %v917_v1, %v255_v37 }
  0x6e   : > { %505 = vst [vmem:[%s953_s25 + $0x1a0] sm:$0xff] %v441_v40  ;;  %v444_v49 = vmax.f32 %v380_v41, 0.0  ;;  %506 = vst [vmem:[%s953_s25 + $0x1a8] sm:$0xff] %v442_v44  ;;  %v381_v53 = vadd.f32 %v919_v2, %v316_v46  ;;  %v382_v54 = vadd.f32 %v919_v2, %v317_v47  ;;  %v321_v55 = vmul.f32 %v917_v1, %v256_v42 }
  0x6f   : > { %507 = vst [vmem:[%s953_s25 + $0x1b0] sm:$0xff] %v443_v45  ;;  %v322_v56 = vmul.f32 %v917_v1, %v257_v43  ;;  %v383_v57 = vadd.f32 %v919_v2, %v318_v50  ;;  %v384_v58 = vadd.f32 %v919_v2, %v319_v51  ;;  %v385_v59 = vadd.f32 %v919_v2, %v320_v52 }
  0x70   : > { %508 = vst [vmem:[%s953_s25 + $0x1b8] sm:$0xff] %v444_v49  ;;  %v323_v60 = vmul.f32 %v917_v1, %v258_v48  ;;  %v445_v61 = vmax.f32 %v381_v53, 0.0  ;;  %v446_v62 = vmax.f32 %v382_v54, 0.0  ;;  %v386_v63 = vadd.f32 %v919_v2, %v321_v55 }
  0x71   : > { %v387_v0 = vadd.f32 %v919_v2, %v322_v56  ;;  %v447_v3 = vmax.f32 %v383_v57, 0.0  ;;  %v448_v4 = vmax.f32 %v384_v58, 0.0  ;;  %v449_v5 = vmax.f32 %v385_v59, 0.0 }
  0x72   : > { %v388_v1 = vadd.f32 %v919_v2, %v323_v60  ;;  %509 = vst [vmem:[%s953_s25 + $0x1c0] sm:$0xff] %v445_v61  ;;  %510 = vst [vmem:[%s953_s25 + $0x1c8] sm:$0xff] %v446_v62  ;;  %v450_v6 = vmax.f32 %v386_v63, 0.0 }
  0x73   : > { %v451_v7 = vmax.f32 %v387_v0, 0.0  ;;  %511 = vst [vmem:[%s953_s25 + $0x1d0] sm:$0xff] %v447_v3  ;;  %512 = vst [vmem:[%s953_s25 + $0x1d8] sm:$0xff] %v448_v4 }
  0x74   : > { %513 = vst [vmem:[%s953_s25 + $0x1e0] sm:$0xff] %v449_v5  ;;  %v452_v8 = vmax.f32 %v388_v1, 0.0  ;;  %514 = vst [vmem:[%s953_s25 + $0x1e8] sm:$0xff] %v450_v6 }
  0x75   : > { %515 = vst [vmem:[%s953_s25 + $0x1f0] sm:$0xff] %v451_v7 }
  0x76   : > { %516 = vst [vmem:[%s953_s25 + $0x1f8] sm:$0xff] %v452_v8 }
  0x77   : > { %713 = shalt.err (!%p710_p2)
}
  0x78   : > { %s714_s24 = scalar_lea.hbm %s1179_s13, 8192  ;;  %s718_s30 = scalar_lea.hbm %s1234_s3, 16384 }
  0x79   : > { %p715_p4 = scmp.ne.s32.totalorder %s1179_s13, %s714_s24  ;;  %p719_p9 = scmp.lt.u32.totalorder %s1179_s13, %s1234_s3 }
  0x7a   : > { %p720_p1 = scmp.lt.u32.totalorder %s718_s30, %s714_s24  ;;  %p722_p6 = scmp.lt.u32.totalorder %s714_s24, %s1179_s13 }
  0x7b   : > { %p716_p5 = pnand %p715_p4, %p1241_p11 }
  0x7c   : > { %p721_p3 = por %p720_p1, %p719_p9 }
  0x7d   : > { %p717_p7 = pneg %p716_p5 }
  0x7e   : > { %p723_p12 = por %p722_p6, %p721_p3 }
  0x80   : > { %p724_p13 = pnand %p723_p12, %p717_p7 }
  0x82   : > { %727 = shalt.err (!%p724_p13)
}
  0x83   : > { %s772_s11 = smov 128   ;;  %s773_s6 = smov 8  }
  0x84   : > { %622 = dma.vmem_to_hbm [thread:$0]  (%p1241_p11), %s1181_s10, 8192, %s1179_s13, %s518_s14, %s772_s11, %s772_s11, %s773_s6  }
  0x85 PF: > { %s546_s8 = sand.u32 1, %s754_s16   ;;  %p1242_p8 = scmp.ne.s32.totalorder %s1239_s27, 0 }
  0x86   : > { %p1243_p10 = scmp.ge.s32.totalorder %s766_s19, 2  ;;  %s547_s25 = scalar_lea.sflag [#allocation6], %s546_s8 }
  0x88   : > { %p629_p0 = pnand %p1243_p10, %p1242_p8 }
  0x8a   : > { %749 = dma.done.wait (!%p629_p0), %s547_s25, 8192  }
  0x8b   : > { %751 = vsyncadd (!%p629_p0), %s547_s25, 4294959104  ;;  %p18_p2 = scmp.ge.s32.totalorder %s825_s20, 4   ;;  %s1244_s16 = smov %s758_s17 }
  0x8c   : > { %s1245_s17 = smov %s762_s18  ;;  %s1246_s18 = smov %s837_s23 }
  0x8d   : > { %s1247_s19 = smov %s825_s20  ;;  %20 = sbr.rel (!%p18_p2) target bundleno = 8 (0x8), region = 77 }
  0x94   :  { %552 = vsyncpa [#allocation5], 1 }
  0x95   :  { %554 = vsyncpa [#allocation5 + $0x1], 1 }
  0x96   :  { %555 = vsyncpa [#allocation6], 1 }
  0x97   :  { %557 = vsyncpa [#allocation6 + $0x1], 1 }

</bundles_post_ra>
